<compile_context>
chip_gen: v7x
topology: tpu7x:2x2x1
jax: 0.10.0
libtpu: 0.0.40
codegen_flags: <defaults>
</compile_context>

<pallas_src>
import functools

import jax
import jax.numpy as jnp
from jax.experimental import pallas as pl
from jax.experimental.pallas import tpu as pltpu


def _round_up(x, m):
    return ((x + m - 1) // m) * m


def _pick_tile(dim, target, align):
    """Pick a tile size (multiple of `align`, <= ~target) minimizing padding waste."""
    d = _round_up(max(dim, 1), align)
    if d <= target:
        return d
    n_tiles = -(-d // target)
    return _round_up(-(-d // n_tiles), align)


def _vmem_budget_bytes():
    """Scoped-VMEM budget gated per TPU generation."""
    try:
        cap = pltpu.get_tpu_info().vmem_capacity_bytes
    except Exception:
        cap = 64 * 1024 * 1024  # conservative (v7x-sized) fallback
    if cap >= 100 * 1024 * 1024:
        return 96 * 1024 * 1024  # v5e / v6e: 128 MiB physical VMEM
    return 48 * 1024 * 1024      # v7x-class: 64 MiB physical VMEM


# ----------------------------- kernels --------------------------------------


def _linear_kernel_inplace(x_ref, wt_ref, b_ref, o_ref, *, precision):
    """f32 output: accumulate directly into the resident output tile.

    x_ref  : (tm, tk)  activation tile
    wt_ref : (tk, tn)  weight tile, pre-transposed (in, out) -> MXU-native
    b_ref  : (1,  tn)  bias tile for this N block (f32)
    o_ref  : (tm, tn)  f32 output tile, resident across the K grid axis
    """
    k = pl.program_id(2)

    @pl.when(k == 0)
    def _():
        o_ref[...] = jnp.broadcast_to(b_ref[...].astype(o_ref.dtype), o_ref.shape)

    o_ref[...] += jnp.dot(
        x_ref[...], wt_ref[...],
        preferred_element_type=jnp.float32, precision=precision,
    )


def _linear_kernel_scratch(x_ref, wt_ref, b_ref, o_ref, acc_ref, *, precision):
    """Narrow-output path: f32 VMEM accumulator, downcast + bias at k==last."""
    k = pl.program_id(2)

    @pl.when(k == 0)
    def _():
        acc_ref[...] = jnp.zeros_like(acc_ref)

    acc_ref[...] += jnp.dot(
        x_ref[...], wt_ref[...],
        preferred_element_type=jnp.float32, precision=precision,
    )

    @pl.when(k == pl.num_programs(2) - 1)
    def _():
        o_ref[...] = (acc_ref[...] + b_ref[...].astype(jnp.float32)).astype(o_ref.dtype)


# ----------------------------- wrappers --------------------------------------


def _linear_call(xp, wt, bp, *, out_dtype, tm, tn, tk, precision):
    """Tiled y = xp @ wt + bp on padded operands (Mp,Kp)@(Kp,Np)."""
    Mp, Kp = xp.shape
    Kp2, Np = wt.shape
    assert Kp == Kp2
    grid = (Mp // tm, Np // tn, Kp // tk)
    gm, gn, gk = grid

    in_itemsize = jnp.dtype(xp.dtype).itemsize
    out_itemsize = jnp.dtype(out_dtype).itemsize

    use_inplace = jnp.dtype(out_dtype) == jnp.dtype(jnp.float32)
    if use_inplace:
        kernel = functools.partial(_linear_kernel_inplace, precision=precision)
        scratch_shapes = []
        acc_bytes = 0
    else:
        kernel = functools.partial(_linear_kernel_scratch, precision=precision)
        scratch_shapes = [pltpu.VMEM((tm, tn), jnp.float32)]
        acc_bytes = tm * tn * 4

    # Double-buffered input/output tiles (+ accumulator if used).
    vmem_needed = (2 * (tm * tk + tk * tn) * in_itemsize
                   + 2 * tn * 4
                   + 2 * tm * tn * out_itemsize
                   + acc_bytes)
    vmem_limit = int(min(_vmem_budget_bytes(),
                         max(32 * 1024 * 1024, 2 * vmem_needed)))

    # Actual HBM traffic: x is re-streamed per N tile, weight per M tile.
    bytes_accessed = int(gn * Mp * Kp * in_itemsize
                         + gm * Np * Kp * in_itemsize
                         + gm * gk * Np * 4
                         + Mp * Np * out_itemsize)

    return pl.pallas_call(
        kernel,
        out_shape=jax.ShapeDtypeStruct((Mp, Np), out_dtype),
        grid_spec=pltpu.PrefetchScalarGridSpec(
            num_scalar_prefetch=0,
            grid=grid,
            in_specs=[
                pl.BlockSpec((tm, tk), lambda i, j, k: (i, k)),   # activations
                pl.BlockSpec((tk, tn), lambda i, j, k: (k, j)),   # weight (in, out)
                pl.BlockSpec((1, tn), lambda i, j, k: (0, j)),    # bias slice
            ],
            out_specs=pl.BlockSpec((tm, tn), lambda i, j, k: (i, j)),
            scratch_shapes=scratch_shapes,
        ),
        compiler_params=pltpu.CompilerParams(
            dimension_semantics=("parallel", "parallel", "arbitrary"),
            vmem_limit_bytes=vmem_limit,
        ),
        cost_estimate=pl.CostEstimate(
            flops=2 * Mp * Np * Kp,
            transcendentals=0,
            bytes_accessed=bytes_accessed,
        ),
    )(xp, wt, bp)


def linear_prepped(x, wt_padded, bias_padded, out_features, *, tn, tk,
                   tm_target=512, compute_dtype=None, precision=None):
    """y = x @ W.T + b with a pre-transposed, pre-padded (Kp, Np) weight."""
    orig_shape = x.shape
    in_f = orig_shape[-1]
    x2 = x.reshape(-1, in_f)
    M = x2.shape[0]
    Kp, Np = wt_padded.shape
    out_dtype = x.dtype

    if compute_dtype is not None and x2.dtype != jnp.dtype(compute_dtype):
        x2 = x2.astype(compute_dtype)

    tm = _pick_tile(M, tm_target, 8)
    Mp = _round_up(M, tm)

    # v7x has 2 TensorCores per chip: if the whole problem fits in one output
    # tile, split N so the "parallel" grid axes expose >= 2 blocks of work.
    # (Harmless on single-TC v5e/v6e.)
    if Mp // tm == 1 and Np // tn == 1 and Np % 256 == 0:
        tn = Np // 2

    xp = x2
    if (Mp, Kp) != x2.shape:
        xp = jnp.pad(x2, ((0, Mp - M), (0, Kp - in_f)))

    out = _linear_call(xp, wt_padded, bias_padded, out_dtype=out_dtype,
                       tm=tm, tn=tn, tk=tk, precision=precision)
    out = out[:M, :out_features]
    return out.reshape(orig_shape[:-1] + (out_features,))


def linear_pallas(x, weight, bias=None, *, tm_target=512, tn_target=1024,
                  tk_target=1024, compute_dtype=None, precision=None):
    """Standalone y = x @ weight.T + bias (weight in PyTorch (out, in) layout).

    Note: prefer LinearPallas, which hoists the weight transpose/pad to init.
    """
    out_f, in_f = weight.shape
    if bias is None:
        bias = jnp.zeros((out_f,), dtype=jnp.float32)

    tk = _pick_tile(in_f, tk_target, 128)
    tn = _pick_tile(out_f, tn_target, 128)
    Kp = _round_up(in_f, tk)
    Np = _round_up(out_f, tn)

    wt = weight.T
    if (Kp, Np) != wt.shape:
        wt = jnp.pad(wt, ((0, Kp - in_f), (0, Np - out_f)))
    if compute_dtype is not None:
        wt = wt.astype(compute_dtype)

    bp = bias if Np == out_f else jnp.pad(bias, (0, Np - out_f))
    bp = bp.reshape(1, Np).astype(jnp.float32)

    return linear_prepped(x, wt, bp, out_f, tn=tn, tk=tk, tm_target=tm_target,
                          compute_dtype=compute_dtype, precision=precision)


class LinearPallas:
    """Mirrors core/module_backup.py::Linear with quantized=False, bias=True."""

    TM_TARGET = 512
    TN_TARGET = 1024
    TK_TARGET = 1024

    def __init__(self, in_features, out_features, key, *,
                 compute_dtype=jnp.float32, precision=None):
        self.in_features = in_features
        self.out_features = out_features
        self.compute_dtype = jnp.dtype(compute_dtype)
        # Set precision=lax.Precision.HIGHEST for strict f32 parity with
        # PyTorch; default (None) matches the previously-verified behavior.
        self.precision = precision

        # _hook_parameters (non-quantized path): weight = torch.randn(out, in)
        # TODO(synk): `reset_parameters` is undefined in the source module; we
        # keep the deterministic standard-normal init here.
        self.weight = jax.random.normal(
            key, (out_features, in_features), dtype=jnp.float32)
        # bias = torch.zeros(out_features)
        self.bias = jnp.zeros((out_features,), dtype=jnp.float32)

        # One-time kernel-side preparation (hoisted out of the per-call path):
        # transpose to MXU-native (in, out) layout and pad to the tile grid.
        self.tk = _pick_tile(in_features, self.TK_TARGET, 128)
        self.tn = _pick_tile(out_features, self.TN_TARGET, 128)
        kp = _round_up(in_features, self.tk)
        np_ = _round_up(out_features, self.tn)

        wt = self.weight.T
        if (kp, np_) != wt.shape:
            wt = jnp.pad(wt, ((0, kp - in_features), (0, np_ - out_features)))
        self._wt_padded = wt.astype(self.compute_dtype)

        bp = self.bias if np_ == out_features else jnp.pad(
            self.bias, (0, np_ - out_features))
        self._bias_padded = bp.reshape(1, np_).astype(jnp.float32)

    def __call__(self, x):
        # TODO(synk): the quantized=True paths (categorical_sample / init_alpha)
        # are undefined in the source module and are not implemented here.
        return linear_prepped(
            x, self._wt_padded, self._bias_padded, self.out_features,
            tn=self.tn, tk=self.tk, tm_target=self.TM_TARGET,
            compute_dtype=self.compute_dtype, precision=self.precision)


if __name__ == "__main__":
    key = jax.random.PRNGKey(0)
    k_w, k_x = jax.random.split(key)

    batch, in_features, out_features = 8, 32, 16
    model = LinearPallas(in_features, out_features, k_w)

    x = jax.random.normal(k_x, (batch, in_features), dtype=jnp.float32)

    y = model(x)
    y = jax.block_until_ready(y)

    # correctness check against plain JAX reference
    y_ref = x @ model.weight.T + model.bias
    assert y.shape == (batch, out_features)
    assert jnp.allclose(y, y_ref, atol=1e-5, rtol=1e-5)

    print("KERNEL_OK")
</pallas_src>

<mosaic_0001>
module attributes {stable_mosaic.version = 11 : i64} {
  func.func @_linear_kernel_inplace(%arg0: i32, %arg1: i32, %arg2: i32, %arg3: memref<8x128xf32, #tpu.memory_space<vmem>>, %arg4: memref<128x128xf32, #tpu.memory_space<vmem>>, %arg5: memref<1x128xf32, #tpu.memory_space<vmem>>, %arg6: memref<8x128xf32, #tpu.memory_space<vmem>>) attributes {dimension_semantics = [#tpu.dimension_semantics<parallel>, #tpu.dimension_semantics<parallel>, #tpu.dimension_semantics<arbitrary>], iteration_bounds = array<i64: 1, 1, 1>, scalar_prefetch = 0 : i64, scratch_operands = 0 : i64, tpu.core_type = #tpu.core_type<tc>, window_params = [{transform_indices = @transform_0, window_bounds = array<i64: 8, 128>}, {transform_indices = @transform_1, window_bounds = array<i64: 128, 128>}, {transform_indices = @transform_2, window_bounds = array<i64: 1, 128>}, {transform_indices = @transform_3, window_bounds = array<i64: 8, 128>}]} {
    %c0_i32 = arith.constant 0 : i32
    %0 = arith.cmpi eq, %arg2, %c0_i32 : i32
    %1 = arith.extui %0 : i1 to i32
    %c0_i32_0 = arith.constant 0 : i32
    %2 = arith.cmpi ne, %1, %c0_i32_0 : i32
    scf.if %2 {
      %c0_8 = arith.constant 0 : index
      %c0_9 = arith.constant 0 : index
      %9 = vector.load %arg5[%c0_8, %c0_9] : memref<1x128xf32, #tpu.memory_space<vmem>>, vector<1x128xf32>
      %10 = vector.shape_cast %9 : vector<1x128xf32> to vector<1x128xf32>
      %11 = vector.broadcast %10 : vector<1x128xf32> to vector<8x128xf32>
      %c0_10 = arith.constant 0 : index
      %c0_11 = arith.constant 0 : index
      %12 = vector.load %arg6[%c0_10, %c0_11] : memref<8x128xf32, #tpu.memory_space<vmem>>, vector<8x128xf32>
      tpu.vector_store %arg6[%c0_10, %c0_11], %11 {strides = array<i32>} : memref<8x128xf32, #tpu.memory_space<vmem>>, vector<8x128xf32>,
    } else {
    }
    %c0 = arith.constant 0 : index
    %c0_1 = arith.constant 0 : index
    %3 = vector.load %arg6[%c0, %c0_1] : memref<8x128xf32, #tpu.memory_space<vmem>>, vector<8x128xf32>
    %c0_2 = arith.constant 0 : index
    %c0_3 = arith.constant 0 : index
    %4 = vector.load %arg3[%c0_2, %c0_3] : memref<8x128xf32, #tpu.memory_space<vmem>>, vector<8x128xf32>
    %c0_4 = arith.constant 0 : index
    %c0_5 = arith.constant 0 : index
    %5 = vector.load %arg4[%c0_4, %c0_5] : memref<128x128xf32, #tpu.memory_space<vmem>>, vector<128x128xf32>
    %cst = arith.constant dense<0.000000e+00> : vector<8x128xf32>
    %6 = tpu.matmul %4, %5, %cst {dimension_numbers = #tpu.dot_dimension_numbers<[1], [0], [0], [1], [0, 0, 1, 1], [], []>} : vector<8x128xf32>, vector<128x128xf32>, vector<8x128xf32> -> vector<8x128xf32>
    %7 = arith.addf %3, %6 : vector<8x128xf32>
    %c0_6 = arith.constant 0 : index
    %c0_7 = arith.constant 0 : index
    %8 = vector.load %arg6[%c0_6, %c0_7] : memref<8x128xf32, #tpu.memory_space<vmem>>, vector<8x128xf32>
    tpu.vector_store %arg6[%c0_6, %c0_7], %7 {strides = array<i32>} : memref<8x128xf32, #tpu.memory_space<vmem>>, vector<8x128xf32>,
    return
  }
  func.func @transform_0(%arg0: i32, %arg1: i32, %arg2: i32) -> (i32, i32) {
    %c0_i32 = arith.constant 0 : i32
    return %arg0, %arg2 : i32, i32
  }
  func.func @transform_1(%arg0: i32, %arg1: i32, %arg2: i32) -> (i32, i32) {
    %c0_i32 = arith.constant 0 : i32
    return %arg2, %arg1 : i32, i32
  }
  func.func @transform_2(%arg0: i32, %arg1: i32, %arg2: i32) -> (i32, i32) {
    %c0_i32 = arith.constant 0 : i32
    %c0_i32_0 = arith.constant 0 : i32
    return %c0_i32, %arg1 : i32, i32
  }
  func.func @transform_3(%arg0: i32, %arg1: i32, %arg2: i32) -> (i32, i32) {
    %c0_i32 = arith.constant 0 : i32
    return %arg0, %arg1 : i32, i32
  }
}

</mosaic_0001>

<bundles_post_ra>
// kernel: tpu_custom_call.1
= control target key start
LH: loop header
LB: loop body
LE: loop exit
PB: predicated region body
PF: predicated region fallthrough
CT: control target
= control target key end

     0   :  { %8 = vsyncpa [#allocation3], 0  ;;  %s390_s0 = inlined_call_operand.hbm [shape: f32[8,128], index: 0, kind: input, shape index: {}]   ;;  %s391_s1 = inlined_call_operand.hbm [shape: f32[128,128], index: 1, kind: input, shape index: {}]   ;;  %s392_s2 = inlined_call_operand.vmem [shape: f32[1,128], index: 2, kind: input, shape index: {}]   ;;  %s393_s3 = inlined_call_operand.hbm [shape: f32[8,128], index: 3, kind: output, shape index: {}]  }
   0x1   :  { %9 = vsyncpa [#allocation6], 0 }
   0x2   :  { %10 = vsyncpa [#allocation4], 0  ;;  %s316_s12 = smov [#allocation2]   ;;  %s317_s14 = smov [#allocation5]  }
   0x3   :  { %s17_s13 = sshll.u32 %s316_s12, 4  ;;  %s26_s15 = sshll.u32 %s317_s14, 4  ;;  %s18_s13 = int_to_ptr.vmem [resolvable:$true] %s17_s13  ;;  %s344_s15 = int_to_ptr.vmem [resolvable:$true] %s26_s15 }
   0x4   :  { %s244_s18 = scalar_lea.hbm %s390_s0, 128 }
   0x5   :  { %p245_p0 = scmp.ne.s32.totalorder %s390_s0, %s244_s18  ;;  %p248_p1 = scmp.lt.u32.totalorder %s244_s18, %s390_s0 }
   0x7   :  { %p250_p2 = pnand %p248_p1, %p245_p0 }
   0x9   :  { %253 = shalt.err (!%p250_p2)
}
   0xa   :  { %s254_s23 = scalar_lea.vmem %s18_s13, 128  ;;  %p259_p4 = scmp.lt.s32.totalorder %s18_s13, %s18_s13 }
   0xb   :  { %p255_p3 = scmp.ne.s32.totalorder %s18_s13, %s254_s23  ;;  %p260_p5 = scmp.lt.s32.totalorder %s254_s23, %s254_s23 }
   0xd   :  { %p261_p6 = por %p260_p5, %p259_p4 }
   0xf   :  { %p262_p7 = pnand %p261_p6, %p255_p3 }
  0x11   :  { %265 = shalt.err (!%p262_p7)
}
  0x12   :  { %20 = dma.hbm_to_vmem [thread:$0]  %s390_s0, 128, %s18_s13, [#allocation3]  }
  0x13   :  { %s266_s28 = scalar_lea.hbm %s391_s1, 2048 }
  0x14   :  { %p267_p8 = scmp.ne.s32.totalorder %s391_s1, %s266_s28  ;;  %p270_p9 = scmp.lt.u32.totalorder %s266_s28, %s391_s1 }
  0x16   :  { %p272_p10 = pnand %p270_p9, %p267_p8 }
  0x18   :  { %275 = shalt.err (!%p272_p10)
}
  0x19   :  { %s276_s6 = scalar_lea.vmem %s344_s15, 2048  ;;  %p281_p12 = scmp.lt.s32.totalorder %s344_s15, %s344_s15 }
  0x1a   :  { %p277_p11 = scmp.ne.s32.totalorder %s344_s15, %s276_s6  ;;  %p282_p13 = scmp.lt.s32.totalorder %s276_s6, %s276_s6 }
  0x1c   :  { %p283_p0 = por %p282_p13, %p281_p12 }
  0x1e   :  { %p284_p1 = pnand %p283_p0, %p277_p11 }
  0x20   :  { %287 = shalt.err (!%p284_p1)
}
  0x21   :  { %s318_s0 = smov 128   ;;  %s319_s7 = smov 8  }
  0x22   :  { %32 = dma.hbm_to_vmem [thread:$0]  %s391_s1, 2048, %s344_s15, [#allocation6], %s318_s0, %s318_s0, %s319_s7  }
  0x23   :  { %310 = dma.done.wait [#allocation3], 128  }
  0x24   :  { %311 = vsyncadd [#allocation3], 4294967168 }
  0x25   :  { %312 = dma.done.wait [#allocation6], 2048  }
  0x26   :  { %313 = vsyncadd [#allocation6], 4294965248  ;;  %v320_v0 = vmov 0.0|0.0   ;;  %vm321_vm0 = vmmov 0   ;;  %v322_v1 = vmov 0.0   ;;  %v55_v2 = vld [vmem:[#allocation5] sm:$0xff] }
  0x27   :  { %212 = vmatprep.subr.bf16.mxu0 %v320_v0  ;;  %209 = vmatprep.mubr.msk.f32.mxu0 %vm321_vm0, %v322_v1  ;;  %v56_v3 = vld [vmem:[#allocation5 + $0x8] sm:$0xff]  ;;  %v57_v4 = vld [vmem:[#allocation5 + $0x10] sm:$0xff]  ;;  %v58_v6 = vld [vmem:[#allocation5 + $0x18] sm:$0xff]  ;;  %s323_s11 = smov [#allocation7]  }
  0x28   :  { %v213_v5 = vpack.c.bf16 %v56_v3, %v55_v2  ;;  %v216_v7 = vpack.c.bf16 %v58_v6, %v57_v4  ;;  %v59_v8 = vld [vmem:[#allocation5 + $0x20] sm:$0xff]  ;;  %v60_v9 = vld [vmem:[#allocation5 + $0x28] sm:$0xff]  ;;  %v61_v11 = vld [vmem:[#allocation5 + $0x30] sm:$0xff]  ;;  %s149_s12 = sshll.u32 %s323_s11, 4  ;;  %s150_s12 = int_to_ptr.vmem [resolvable:$true] %s149_s12 }
  0x29   :  { %v219_v10 = vpack.c.bf16 %v60_v9, %v59_v8  ;;  %v62_v12 = vld [vmem:[#allocation5 + $0x38] sm:$0xff]  ;;  %v63_v14 = vld [vmem:[#allocation5 + $0x40] sm:$0xff]  ;;  %v64_v15 = vld [vmem:[#allocation5 + $0x48] sm:$0xff]  ;;  %s288_s13 = scalar_lea.vmem %s150_s12, 128  ;;  %p293_p3 = scmp.lt.s32.totalorder %s150_s12, %s150_s12 }
  0x2a   :  { %214 = vmatpush3.bf16.msra.mxu0 %v213_v5  ;;  %v222_v13 = vpack.c.bf16 %v62_v12, %v61_v11  ;;  %v225_v16 = vpack.c.bf16 %v64_v15, %v63_v14  ;;  %v65_v17 = vld [vmem:[#allocation5 + $0x50] sm:$0xff]  ;;  %v66_v18 = vld [vmem:[#allocation5 + $0x58] sm:$0xff]  ;;  %v67_v20 = vld [vmem:[#allocation5 + $0x60] sm:$0xff]  ;;  %p289_p2 = scmp.ne.s32.totalorder %s150_s12, %s288_s13  ;;  %p294_p4 = scmp.lt.s32.totalorder %s288_s13, %s288_s13 }
  0x2b   :  { %215 = vmatprep.subr.bf16.mxu0 %v320_v0  ;;  %v228_v19 = vpack.c.bf16 %v66_v18, %v65_v17  ;;  %v68_v21 = vld [vmem:[#allocation5 + $0x68] sm:$0xff]  ;;  %v69_v23 = vld [vmem:[#allocation5 + $0x70] sm:$0xff]  ;;  %v70_v24 = vld [vmem:[#allocation5 + $0x78] sm:$0xff] }
  0x2c   :  { %v231_v22 = vpack.c.bf16 %v68_v21, %v67_v20  ;;  %v234_v25 = vpack.c.bf16 %v70_v24, %v69_v23  ;;  %v54_v26 = vld [vmem:[#allocation2] sm:$0xff]  ;;  %p295_p5 = por %p294_p4, %p293_p3 }
  0x2d   :  { %v159_v27 = vld [vmem:[%s392_s2] ss:$0 sm:$0xff] }
  0x2e   :  { %217 = vmatpush3.bf16.msra.mxu0 %v216_v7  ;;  %p296_p6 = pnand %p295_p5, %p289_p2 }
  0x2f   :  { %218 = vmatprep.subr.bf16.mxu0 %v320_v0 }
  0x32   :  { %220 = vmatpush3.bf16.msra.mxu0 %v219_v10 }
  0x33   :  { %221 = vmatprep.subr.bf16.mxu0 %v320_v0 }
  0x36   :  { %223 = vmatpush3.bf16.msra.mxu0 %v222_v13 }
  0x37   :  { %224 = vmatprep.subr.bf16.mxu0 %v320_v0 }
  0x3a   :  { %226 = vmatpush3.bf16.msra.mxu0 %v225_v16 }
  0x3b   :  { %227 = vmatprep.subr.bf16.mxu0 %v320_v0 }
  0x3e   :  { %229 = vmatpush3.bf16.msra.mxu0 %v228_v19 }
  0x3f   :  { %230 = vmatprep.subr.bf16.mxu0 %v320_v0 }
  0x42   :  { %232 = vmatpush3.bf16.msra.mxu0 %v231_v22 }
  0x43   :  { %233 = vmatprep.subr.bf16.mxu0 %v320_v0 }
  0x46   :  { %235 = vmatpush3.bf16.msra.mxu0 %v234_v25 }
  0x49   :  { %210 = vmatmul.mubr.f32.vlgmr.msra.gmra.mrb[0].mxu0 %v54_v26 }
 0x11c   :  { %v137_v28 = vpop.f32.mrb[0].mxu0 }
 0x11d   :  { %v141_v29 = vadd.f32 %v159_v27, %v137_v28  ;;  %v211_v30 = vpop.f32.mrb[1].mxu0 }
 0x11f   :  { %142 = vst [vmem:[#allocation7] sm:$0xff] %v141_v29 }
 0x120   :  { %299 = shalt.err (!%p296_p6)
}
 0x121   :  { %s300_s16 = scalar_lea.hbm %s393_s3, 128 }
 0x122   :  { %p301_p7 = scmp.ne.s32.totalorder %s393_s3, %s300_s16  ;;  %p304_p8 = scmp.lt.u32.totalorder %s300_s16, %s393_s3 }
 0x124   :  { %p306_p9 = pnand %p304_p8, %p301_p7 }
 0x126   :  { %309 = shalt.err (!%p306_p9)
}
 0x127   :  { %152 = dma.vmem_to_hbm [thread:$0]  %s150_s12, 128, %s393_s3, [#allocation4]  }
 0x128   :  { %314 = dma.done.wait [#allocation4], 128  }
 0x129   :  { %315 = vsyncadd [#allocation4], 4294967168 }
 0x12a   :  { %156 = vsyncpa [#allocation3], 1 }
 0x12b   :  { %157 = vsyncpa [#allocation6], 1 }
 0x12c   :  { %158 = vsyncpa [#allocation4], 1 }

</bundles_post_ra>
